<compile_context>
chip_gen: v6e
topology: v6e:2x2x1
jax: 0.10.0
libtpu: 0.0.40
codegen_flags: <defaults>
</compile_context>

<pallas_src>
import functools

import jax
import jax.numpy as jnp
from jax.experimental import pallas as pl
from jax.experimental.pallas import tpu as pltpu

_LANE = 128
_SUBLANE = 8
_MIB = 1024 * 1024


def _tpu_generation():
    """Best-effort TPU generation detection (used only for tuning knobs)."""
    try:
        kind = jax.devices()[0].device_kind.lower()
    except Exception:
        return "unknown"
    if "v5" in kind:
        return "v5e"
    if "v6" in kind:
        return "v6e"
    if "7" in kind:
        return "v7x"
    return "unknown"


def _mse_kernel(x_ref, t_ref, out_ref, acc_ref, *, block_rows, blocks_per_split,
                valid_rows, has_core_axis, may_need_mask):
    if has_core_axis:
        c = pl.program_id(0)            # TensorCore split axis (CORE_PARALLEL)
        i = pl.program_id(1)            # reduction axis ("arbitrary")
        last = pl.num_programs(1) - 1
    else:
        c = 0
        i = pl.program_id(0)
        last = pl.num_programs(0) - 1

    @pl.when(i == 0)
    def _():
        acc_ref[...] = jnp.zeros_like(acc_ref)

    d = x_ref[...].astype(jnp.float32) - t_ref[...].astype(jnp.float32)
    sq = d * d

    def _accumulate(vals):
        # Lane/sublane-preserving per-step reduction (VPU only); the
        # cross-lane reduce is deferred to the tiny partial-sum output.
        if block_rows % _SUBLANE == 0:
            acc_ref[...] += jnp.sum(
                vals.reshape(block_rows // _SUBLANE, _SUBLANE, _LANE), axis=0)
        else:  # tiny inputs only: block_rows == full row count, not a sublane multiple
            acc_ref[0:1, :] += jnp.sum(vals, axis=0, keepdims=True)

    if may_need_mask:
        # Logical (unclamped) block index -> global row offset of this tile.
        row_off = (c * blocks_per_split + i) * block_rows
        is_interior = row_off + block_rows <= valid_rows

        @pl.when(is_interior)
        def _():
            _accumulate(sq)                        # hot path: no mask ops at all

        @pl.when(jnp.logical_not(is_interior))
        def _():
            # Ragged tail block or clamped/overflow block: zero out everything
            # past the true row count so garbage never leaks into the sum.
            row_iota = jax.lax.broadcasted_iota(jnp.int32, (block_rows, _LANE), 0)
            mask = (row_off + row_iota) < valid_rows
            _accumulate(jnp.where(mask, sq, 0.0))
    else:
        _accumulate(sq)

    @pl.when(i == last)
    def _():
        out_ref[0] = acc_ref[...]


def _run_mse_kernel(x2, t2, rows, *, core_splits, block_rows, core_parallel,
                    vmem_limit):
    blocks_total = pl.cdiv(rows, block_rows)
    bpc = pl.cdiv(blocks_total, core_splits)   # blocks per core split
    last_block = blocks_total - 1
    has_core_axis = core_splits > 1
    may_need_mask = (rows % block_rows != 0) or (core_splits * bpc != blocks_total)

    kernel = functools.partial(
        _mse_kernel,
        block_rows=block_rows,
        blocks_per_split=bpc,
        valid_rows=rows,
        has_core_axis=has_core_axis,
        may_need_mask=may_need_mask,
    )

    if has_core_axis:
        grid = (core_splits, bpc)

        def in_map(c, i):
            # Clamp so an overflow block of an odd split still reads valid
            # memory; its contribution is zeroed by the in-kernel mask.
            return (jnp.minimum(c * bpc + i, last_block), 0)

        out_map = lambda c, i: (c, 0, 0)
        if core_parallel:
            dim_sem = (pltpu.CORE_PARALLEL, pltpu.ARBITRARY)
        else:
            dim_sem = ("parallel", "arbitrary")
    else:
        grid = (bpc,)

        def in_map(i):
            return (jnp.minimum(i, last_block), 0)

        out_map = lambda i: (0, 0, 0)
        dim_sem = ("arbitrary",)

    itemsize = jnp.dtype(x2.dtype).itemsize
    n_main = rows * _LANE
    cost = pl.CostEstimate(
        flops=3 * n_main,
        transcendentals=0,
        bytes_accessed=2 * n_main * itemsize + core_splits * _SUBLANE * _LANE * 4,
    )

    cp_kwargs = dict(dimension_semantics=dim_sem)
    if vmem_limit is not None:
        cp_kwargs["vmem_limit_bytes"] = vmem_limit

    partials = pl.pallas_call(
        kernel,
        out_shape=jax.ShapeDtypeStruct((core_splits, _SUBLANE, _LANE), jnp.float32),
        grid_spec=pltpu.PrefetchScalarGridSpec(
            num_scalar_prefetch=0,
            grid=grid,
            in_specs=[
                pl.BlockSpec((block_rows, _LANE), in_map),
                pl.BlockSpec((block_rows, _LANE), in_map),
            ],
            out_specs=pl.BlockSpec((1, _SUBLANE, _LANE), out_map),
            scratch_shapes=[pltpu.VMEM((_SUBLANE, _LANE), jnp.float32)],
        ),
        compiler_params=pltpu.CompilerParams(**cp_kwargs),
        cost_estimate=cost,
    )(x2, t2)

    return jnp.sum(partials)


def _mse_loss_pallas(x, target):
    assert x.shape == target.shape, "input / target shape mismatch"
    n_true = x.size
    if n_true == 0:
        return jnp.float32(0.0)

    # Free reshape of contiguous NCHW; dtype passes through natively (no cast).
    flat_x = x.reshape(-1)
    flat_t = target.reshape(-1)

    rows = n_true // _LANE
    tail = n_true % _LANE
    n_main = rows * _LANE

    if tail:
        # Lane-remainder tail (< 128 elements): tiny XLA expression instead of
        # materialising padded copies of both arrays.
        tx = flat_x[n_main:].astype(jnp.float32)
        tt = flat_t[n_main:].astype(jnp.float32)
        tail_sum = jnp.sum((tx - tt) ** 2)
    else:
        tail_sum = jnp.float32(0.0)

    if rows == 0:
        return tail_sum * (1.0 / float(n_true))

    if tail:
        # TODO(synk): this static slice copies the main portion once in the
        # rare ragged case; never triggers for conv feature maps (N % 128 == 0).
        flat_x = flat_x[:n_main]
        flat_t = flat_t[:n_main]

    x2 = flat_x.reshape(rows, _LANE)
    t2 = flat_t.reshape(rows, _LANE)

    # Per-generation tuning: bytes per input per pipeline buffer.
    gen = _tpu_generation()
    if gen == "v5e":
        block_bytes, vmem_limit, want_core_split = 2 * _MIB, None, False
    elif gen == "v6e":
        block_bytes, vmem_limit, want_core_split = 4 * _MIB, None, False
    elif gen == "v7x":
        block_bytes, vmem_limit, want_core_split = 8 * _MIB, 44 * _MIB, True
    else:
        block_bytes, vmem_limit, want_core_split = 2 * _MIB, None, False

    itemsize = jnp.dtype(x.dtype).itemsize
    block_rows_target = max(_SUBLANE, block_bytes // (_LANE * itemsize))
    block_rows = min(block_rows_target, rows)   # small inputs: block == full dim
    blocks_total = pl.cdiv(rows, block_rows)

    use_core_split = (
        want_core_split
        and blocks_total >= 2
        and getattr(pltpu, "CORE_PARALLEL", None) is not None
    )

    run = functools.partial(
        _run_mse_kernel, x2, t2, rows,
        block_rows=block_rows, vmem_limit=vmem_limit,
    )

    if use_core_split:
        try:
            main_sum = run(core_splits=2, core_parallel=True)
        except Exception:
            # Fallback if CORE_PARALLEL lowering is unavailable on this stack.
            main_sum = run(core_splits=1, core_parallel=False)
    else:
        main_sum = run(core_splits=1, core_parallel=False)

    return (main_sum + tail_sum) * (1.0 / float(n_true))


class ContentLoss:
    """JAX/Pallas equivalent of the PyTorch ContentLoss module."""

    def __init__(self, target):
        # .detach() in PyTorch just stops gradients; target is held constant.
        self.target = jax.lax.stop_gradient(target)
        self.loss = None

    def __call__(self, x):
        # TODO(synk): storing self.loss as a side effect holds a tracer if the
        # module is invoked under jit; fine for eager use like the original.
        self.loss = _mse_loss_pallas(x, self.target)
        return x  # pass-through, exactly like the PyTorch forward


if __name__ == "__main__":
    key = jax.random.PRNGKey(0)
    k1, k2 = jax.random.split(key)

    # Small NCHW feature maps: batch=2, channels=4, spatial=16x16
    x = jax.random.normal(k1, (2, 4, 16, 16), dtype=jnp.float32)
    target = jax.random.normal(k2, (2, 4, 16, 16), dtype=jnp.float32)

    module = ContentLoss(target)
    out = module(x)

    out = jax.block_until_ready(out)
    loss = jax.block_until_ready(module.loss)

    # Correctness check against plain-JAX reference.
    ref_loss = jnp.mean((x - target) ** 2)
    assert jnp.allclose(loss, ref_loss, rtol=1e-5, atol=1e-6), (loss, ref_loss)
    assert out.shape == x.shape and jnp.array_equal(out, x)

    print("KERNEL_OK")
</pallas_src>

<mosaic_0001>
module attributes {stable_mosaic.version = 11 : i64} {
  func.func @_mse_kernel(%arg0: i32, %arg1: memref<16x128xf32, #tpu.memory_space<vmem>>, %arg2: memref<16x128xf32, #tpu.memory_space<vmem>>, %arg3: memref<1x8x128xf32, #tpu.memory_space<vmem>>, %arg4: memref<8x128xf32, #tpu.memory_space<vmem>>) attributes {dimension_semantics = [#tpu.dimension_semantics<arbitrary>], iteration_bounds = array<i64: 1>, scalar_prefetch = 0 : i64, scratch_operands = 1 : i64, tpu.core_type = #tpu.core_type<tc>, window_params = [{transform_indices = @transform_0, window_bounds = array<i64: 16, 128>}, {transform_indices = @transform_1, window_bounds = array<i64: 16, 128>}, {pipeline_mode = #tpu.pipeline_mode<synchronous>, transform_indices = @transform_2, window_bounds = array<i64: 1, 8, 128>}]} {
    %c0_i32 = arith.constant 0 : i32
    %0 = arith.cmpi eq, %arg0, %c0_i32 : i32
    %1 = arith.extui %0 : i1 to i32
    %c0_i32_0 = arith.constant 0 : i32
    %2 = arith.cmpi ne, %1, %c0_i32_0 : i32
    scf.if %2 {
      %cst_10 = arith.constant 0.000000e+00 : f32
      %15 = vector.broadcast %cst_10 : f32 to vector<8x128xf32>
      %c0_11 = arith.constant 0 : index
      %c0_12 = arith.constant 0 : index
      %16 = vector.load %arg4[%c0_11, %c0_12] : memref<8x128xf32, #tpu.memory_space<vmem>>, vector<8x128xf32>
      tpu.vector_store %arg4[%c0_11, %c0_12], %15 {strides = array<i32>} : memref<8x128xf32, #tpu.memory_space<vmem>>, vector<8x128xf32>,
    } else {
    }
    %c0 = arith.constant 0 : index
    %c0_1 = arith.constant 0 : index
    %3 = vector.load %arg1[%c0, %c0_1] : memref<16x128xf32, #tpu.memory_space<vmem>>, vector<16x128xf32>
    %c0_2 = arith.constant 0 : index
    %c0_3 = arith.constant 0 : index
    %4 = vector.load %arg2[%c0_2, %c0_3] : memref<16x128xf32, #tpu.memory_space<vmem>>, vector<16x128xf32>
    %5 = arith.subf %3, %4 : vector<16x128xf32>
    %6 = arith.mulf %5, %5 : vector<16x128xf32>
    %c0_4 = arith.constant 0 : index
    %c0_5 = arith.constant 0 : index
    %7 = vector.load %arg4[%c0_4, %c0_5] : memref<8x128xf32, #tpu.memory_space<vmem>>, vector<8x128xf32>
    %8 = vector.shape_cast %6 : vector<16x128xf32> to vector<2x8x128xf32>
    %cst = arith.constant dense<0.000000e+00> : vector<8x128xf32>
    %9 = vector.multi_reduction <add>, %8, %cst [0] : vector<2x8x128xf32> to vector<8x128xf32>
    %10 = arith.addf %7, %9 : vector<8x128xf32>
    %c0_6 = arith.constant 0 : index
    %c0_7 = arith.constant 0 : index
    %11 = vector.load %arg4[%c0_6, %c0_7] : memref<8x128xf32, #tpu.memory_space<vmem>>, vector<8x128xf32>
    tpu.vector_store %arg4[%c0_6, %c0_7], %10 {strides = array<i32>} : memref<8x128xf32, #tpu.memory_space<vmem>>, vector<8x128xf32>,
    %c0_i32_8 = arith.constant 0 : i32
    %12 = arith.cmpi eq, %arg0, %c0_i32_8 : i32
    %13 = arith.extui %12 : i1 to i32
    %c0_i32_9 = arith.constant 0 : i32
    %14 = arith.cmpi ne, %13, %c0_i32_9 : i32
    scf.if %14 {
      %c0_10 = arith.constant 0 : index
      %c0_11 = arith.constant 0 : index
      %15 = vector.load %arg4[%c0_10, %c0_11] : memref<8x128xf32, #tpu.memory_space<vmem>>, vector<8x128xf32>
      %c0_12 = arith.constant 0 : index
      %c0_13 = arith.constant 0 : index
      %c0_14 = arith.constant 0 : index
      %16 = vector.load %arg3[%c0_12, %c0_13, %c0_14] : memref<1x8x128xf32, #tpu.memory_space<vmem>>, vector<1x8x128xf32>
      %17 = vector.shape_cast %16 : vector<1x8x128xf32> to vector<8x128xf32>
      %18 = vector.shape_cast %15 : vector<8x128xf32> to vector<1x8x128xf32>
      tpu.vector_store %arg3[%c0_12, %c0_13, %c0_14], %18 {strides = array<i32>} : memref<1x8x128xf32, #tpu.memory_space<vmem>>, vector<1x8x128xf32>,
    } else {
    }
    return
  }
  func.func @transform_0(%arg0: i32) -> (i32, i32) {
    %c0_i32 = arith.constant 0 : i32
    %0 = arith.minsi %arg0, %c0_i32 : i32
    %c0_i32_0 = arith.constant 0 : i32
    %c0_i32_1 = arith.constant 0 : i32
    return %0, %c0_i32_0 : i32, i32
  }
  func.func @transform_1(%arg0: i32) -> (i32, i32) {
    %c0_i32 = arith.constant 0 : i32
    %0 = arith.minsi %arg0, %c0_i32 : i32
    %c0_i32_0 = arith.constant 0 : i32
    %c0_i32_1 = arith.constant 0 : i32
    return %0, %c0_i32_0 : i32, i32
  }
  func.func @transform_2(%arg0: i32) -> (i32, i32, i32) {
    %c0_i32 = arith.constant 0 : i32
    %c0_i32_0 = arith.constant 0 : i32
    %c0_i32_1 = arith.constant 0 : i32
    %c0_i32_2 = arith.constant 0 : i32
    return %c0_i32, %c0_i32_0, %c0_i32_1 : i32, i32, i32
  }
}

</mosaic_0001>

<bundles_post_ra>
// kernel: tpu_custom_call.1
= control target key start
LH: loop header
LB: loop body
LE: loop exit
PB: predicated region body
PF: predicated region fallthrough
CT: control target
= control target key end

     0   :  { %7 = vsyncpa [#allocation4], 0  ;;  %s178_s0 = inlined_call_operand.hbm [shape: f32[16,128], index: 0, kind: input, shape index: {}]   ;;  %s179_s1 = inlined_call_operand.hbm [shape: f32[16,128], index: 1, kind: input, shape index: {}]   ;;  %s180_s2 = inlined_call_operand.hbm [shape: f32[1,8,128], index: 2, kind: output, shape index: {}]  }
   0x1   :  { %8 = vsyncpa [#allocation7], 0 }
   0x2   :  { %9 = vsyncpa [#allocation5], 0  ;;  %s149_s9 = smov [#allocation3]  }
   0x3   :  { %s15_s10 = sshll.u32 %s149_s9, 4  ;;  %s16_s10 = int_to_ptr.vmem [resolvable:$true] %s15_s10 }
   0x4   :  { %s91_s11 = scalar_lea.vmem %s16_s10, 256  ;;  %p96_p1 = scmp.lt.s32.totalorder %s16_s10, %s16_s10 }
   0x5   :  { %p92_p0 = scmp.ne.s32.totalorder %s16_s10, %s91_s11  ;;  %p97_p2 = scmp.lt.s32.totalorder %s91_s11, %s91_s11 }
   0x7   :  { %p98_p3 = por %p97_p2, %p96_p1 }
   0x9   :  { %p99_p4 = pnand %p98_p3, %p92_p0 }
   0xb   :  { %102 = shalt.err (!%p99_p4)
}
   0xc   :  { %s150_s12 = smov 128   ;;  %s151_s13 = smov 8  }
   0xd   :  { %21 = dma.hbm_to_vmem [thread:$0]  %s178_s0, 256, %s16_s10, [#allocation4], %s150_s12, %s150_s12, %s151_s13  }
   0xe   :  { %s152_s16 = smov [#allocation6]  }
   0xf   :  { %s27_s17 = sshll.u32 %s152_s16, 4  ;;  %s28_s17 = int_to_ptr.vmem [resolvable:$true] %s27_s17 }
  0x10   :  { %s111_s18 = scalar_lea.vmem %s28_s17, 256  ;;  %p116_p6 = scmp.lt.s32.totalorder %s28_s17, %s28_s17 }
  0x11   :  { %p112_p5 = scmp.ne.s32.totalorder %s28_s17, %s111_s18  ;;  %p117_p7 = scmp.lt.s32.totalorder %s111_s18, %s111_s18 }
  0x13   :  { %p118_p8 = por %p117_p7, %p116_p6 }
  0x15   :  { %p119_p9 = pnand %p118_p8, %p112_p5 }
  0x17   :  { %122 = shalt.err (!%p119_p9)
}
  0x18   :  { %33 = dma.hbm_to_vmem [thread:$0]  %s179_s1, 256, %s28_s17, [#allocation7], %s150_s12, %s150_s12, %s151_s13  }
  0x19   :  { %143 = dma.done.wait [#allocation4], 256  }
  0x1a   :  { %144 = vsyncadd [#allocation4], 4294967040 }
  0x1b   :  { %145 = dma.done.wait [#allocation7], 256  }
  0x1c   :  { %146 = vsyncadd [#allocation7], 4294967040  ;;  %v45_v0 = vld [vmem:[#allocation3] sm:$0xff]  ;;  %v46_v1 = vld [vmem:[#allocation3 + $0x8] sm:$0xff]  ;;  %s153_s0 = smov [#allocation8]  }
  0x1d   :  { %v47_v2 = vld [vmem:[#allocation6] sm:$0xff]  ;;  %v48_v3 = vld [vmem:[#allocation6 + $0x8] sm:$0xff]  ;;  %s68_s21 = sshll.u32 %s153_s0, 4  ;;  %s69_s21 = int_to_ptr.vmem [resolvable:$true] %s68_s21 }
  0x1e   :  { %v49_v4 = vsub.f32 %v45_v0, %v47_v2  ;;  %v50_v5 = vsub.f32 %v46_v1, %v48_v3  ;;  %s123_s22 = scalar_lea.vmem %s69_s21, 128  ;;  %p128_p11 = scmp.lt.s32.totalorder %s69_s21, %s69_s21 }
  0x1f   :  { %p124_p10 = scmp.ne.s32.totalorder %s69_s21, %s123_s22  ;;  %p129_p12 = scmp.lt.s32.totalorder %s123_s22, %s123_s22 }
  0x20   :  { %v51_v6 = vmul.f32 %v49_v4, %v49_v4  ;;  %v52_v7 = vmul.f32 %v50_v5, %v50_v5 }
  0x21   :  { %p130_p13 = por %p129_p12, %p128_p11 }
  0x22   :  { %v54_v8 = vadd.f32 %v52_v7, %v51_v6 }
  0x23   :  { %p131_p0 = pnand %p130_p13, %p124_p10 }
  0x24   :  { %61 = vst [vmem:[#allocation8] sm:$0xff] %v54_v8 }
  0x25   :  { %134 = shalt.err (!%p131_p0)
}
  0x26   :  { %71 = dma.vmem_to_hbm [thread:$0]  %s69_s21, 128, %s180_s2, [#allocation5]  }
  0x27   :  { %147 = dma.done.wait [#allocation5], 128  }
  0x28   :  { %148 = vsyncadd [#allocation5], 4294967168 }
  0x29   :  { %75 = vsyncpa [#allocation4], 1 }
  0x2a   :  { %76 = vsyncpa [#allocation7], 1 }
  0x2b   :  { %77 = vsyncpa [#allocation5], 1 }

</bundles_post_ra>
